<compile_context>
chip_gen: v5e
topology: v5e:2x2
jax: 0.10.0
libtpu: 0.0.40
codegen_flags: <defaults>
</compile_context>

<pallas_src>
import functools

import jax
import jax.numpy as jnp
from jax.experimental import pallas as pl
from jax.experimental.pallas import tpu as pltpu

_LANE = 128


def _round_up(x, m):
    return ((x + m - 1) // m) * m


def _clipped_hardtanh_kernel(x_ref, o_ref, *, scale, inv_scale, dequantize):
    # Load in the stored dtype, compute in f32 on the VPU.
    x = x_ref[...].astype(jnp.float32)
    x = jnp.clip(x, -1.0, 1.0)                 # F.hardtanh
    q = jnp.round(x * scale)                   # linear_quantize (zero_point = 0)
    out = q * inv_scale if dequantize else q   # linear_dequantize (reciprocal mul)
    o_ref[...] = out.astype(o_ref.dtype)


def clipped_hardtanh(x, alpha_w=1.0, num_bits=4, dequantize=True):
    """JAX/Pallas equivalent of ClippedHardTanh(num_bits).forward(x)."""
    orig_shape = x.shape
    dtype = x.dtype
    total = x.size
    itemsize = jnp.dtype(dtype).itemsize
    # Sublane packing multiple: f32 -> 8, bf16/f16 -> 16, int8/fp8 -> 32.
    packing = max(8, 32 // itemsize)

    # Flatten to lane-dense (rows, 128).  Only pad the (rare) sub-128 tail.
    flat = x.reshape(-1)
    pad = (-total) % _LANE
    if pad:
        flat = jnp.pad(flat, (0, pad))
    x2 = flat.reshape(-1, _LANE)
    rows = x2.shape[0]

    # ~2 MiB of input per block (see header notes).  Ragged last block is
    # masked by Pallas, so no requirement that block_rows divides rows.
    BLOCK_BYTES = 2 * 1024 * 1024
    budget_rows = max(packing, BLOCK_BYTES // (_LANE * itemsize))
    block_rows = min(budget_rows, _round_up(rows, packing))
    block_rows = _round_up(block_rows, packing)
    grid = (pl.cdiv(rows, block_rows),)

    # Static quantization parameters (alpha_w buffer is 1.0 in the module).
    n_levels = float(2 ** (num_bits - 1) - 1)      # 7 for num_bits=4
    alpha = float(alpha_w)
    scale = n_levels / alpha
    inv_scale = alpha / n_levels

    nbytes = rows * _LANE * itemsize
    out2 = pl.pallas_call(
        functools.partial(
            _clipped_hardtanh_kernel,
            scale=scale,
            inv_scale=inv_scale,
            dequantize=dequantize,
        ),
        out_shape=jax.ShapeDtypeStruct((rows, _LANE), dtype),
        grid=grid,
        in_specs=[pl.BlockSpec((block_rows, _LANE), lambda i: (i, 0))],
        out_specs=pl.BlockSpec((block_rows, _LANE), lambda i: (i, 0)),
        compiler_params=pltpu.CompilerParams(
            dimension_semantics=("parallel",),
        ),
        cost_estimate=pl.CostEstimate(
            flops=4 * rows * _LANE,          # clip(2) + mul + mul (round ~free)
            transcendentals=0,
            bytes_accessed=2 * nbytes,       # read + write
        ),
    )(x2)

    out = out2.reshape(-1)
    if pad:
        out = out[:total]
    return out.reshape(orig_shape)


if __name__ == "__main__":
    key = jax.random.PRNGKey(0)
    # Small NCHW activation tensor, scaled so some values exceed [-1, 1]
    # and the hardtanh clipping path is exercised.
    x = jax.random.normal(key, (2, 4, 16, 16), dtype=jnp.float32) * 1.5

    num_bits = 4
    alpha_w = 1.0  # module buffer: torch.Tensor([1.0])

    out = clipped_hardtanh(x, alpha_w=alpha_w, num_bits=num_bits, dequantize=True)
    out = jax.block_until_ready(out)

    # Pure-JAX reference for a correctness sanity check.
    n = float(2 ** (num_bits - 1) - 1)
    scale = n / alpha_w
    ref = jnp.round(jnp.clip(x, -1.0, 1.0) * scale) / scale
    assert out.shape == x.shape and out.dtype == x.dtype
    assert jnp.allclose(out, ref, atol=1e-6), "mismatch vs reference"

    # Also exercise a ragged / non-multiple-of-128 shape and a bf16 input.
    y = jax.random.normal(jax.random.PRNGKey(1), (3, 5, 7), dtype=jnp.bfloat16) * 2.0
    out_y = jax.block_until_ready(clipped_hardtanh(y, num_bits=num_bits))
    ref_y = (jnp.round(jnp.clip(y.astype(jnp.float32), -1.0, 1.0) * scale) / scale
             ).astype(jnp.bfloat16)
    assert out_y.shape == y.shape and out_y.dtype == y.dtype
    assert jnp.allclose(out_y.astype(jnp.float32), ref_y.astype(jnp.float32), atol=1e-2)

    print("KERNEL_OK")
</pallas_src>

<mosaic_0001>
module attributes {stable_mosaic.version = 11 : i64} {
  func.func @_clipped_hardtanh_kernel(%arg0: i32, %arg1: memref<16x128xf32, #tpu.memory_space<vmem>>, %arg2: memref<16x128xf32, #tpu.memory_space<vmem>>) attributes {dimension_semantics = [#tpu.dimension_semantics<parallel>], iteration_bounds = array<i64: 1>, scalar_prefetch = 0 : i64, scratch_operands = 0 : i64, tpu.core_type = #tpu.core_type<tc>, window_params = [{transform_indices = @transform_0, window_bounds = array<i64: 16, 128>}, {transform_indices = @transform_1, window_bounds = array<i64: 16, 128>}]} {
    %c0 = arith.constant 0 : index
    %c0_0 = arith.constant 0 : index
    %0 = vector.load %arg1[%c0, %c0_0] : memref<16x128xf32, #tpu.memory_space<vmem>>, vector<16x128xf32>
    %cst = arith.constant -1.000000e+00 : f32
    %cst_1 = arith.constant 1.000000e+00 : f32
    %1 = vector.broadcast %cst : f32 to vector<16x128xf32>
    %2 = arith.maximumf %1, %0 : vector<16x128xf32>
    %3 = vector.broadcast %cst_1 : f32 to vector<16x128xf32>
    %4 = arith.minimumf %3, %2 : vector<16x128xf32>
    %cst_2 = arith.constant 7.000000e+00 : f32
    %5 = vector.broadcast %cst_2 : f32 to vector<16x128xf32>
    %6 = arith.mulf %4, %5 : vector<16x128xf32>
    %7 = math.roundeven %6 : vector<16x128xf32>
    %cst_3 = arith.constant 0.142857149 : f32
    %8 = vector.broadcast %cst_3 : f32 to vector<16x128xf32>
    %9 = arith.mulf %7, %8 : vector<16x128xf32>
    %c0_4 = arith.constant 0 : index
    %c0_5 = arith.constant 0 : index
    %10 = vector.load %arg2[%c0_4, %c0_5] : memref<16x128xf32, #tpu.memory_space<vmem>>, vector<16x128xf32>
    tpu.vector_store %arg2[%c0_4, %c0_5], %9 {strides = array<i32>} : memref<16x128xf32, #tpu.memory_space<vmem>>, vector<16x128xf32>,
    return
  }
  func.func @transform_0(%arg0: i32) -> (i32, i32) {
    %c0_i32 = arith.constant 0 : i32
    %c0_i32_0 = arith.constant 0 : i32
    return %arg0, %c0_i32 : i32, i32
  }
  func.func @transform_1(%arg0: i32) -> (i32, i32) {
    %c0_i32 = arith.constant 0 : i32
    %c0_i32_0 = arith.constant 0 : i32
    return %arg0, %c0_i32 : i32, i32
  }
}

</mosaic_0001>

<bundles_post_ra>
// kernel: tpu_custom_call.1
= control target key start
LH: loop header
LB: loop body
LE: loop exit
PB: predicated region body
PF: predicated region fallthrough
CT: control target
= control target key end

     0   :  { %6 = vsyncpa [#allocation3], 0  ;;  %s158_s0 = inlined_call_operand.hbm [shape: f32[16,128], index: 0, kind: input, shape index: {}]   ;;  %s159_s1 = inlined_call_operand.hbm [shape: f32[16,128], index: 1, kind: output, shape index: {}]  }
   0x1   :  { %7 = vsyncpa [#allocation4], 0  ;;  %s12_s8 = sshll.u32 %s158_s0, 4  ;;  %s132_s9 = smov [#allocation2]   ;;  %s13_s8 = int_to_ptr.hbm [resolvable:$true] %s12_s8 }
   0x2   :  { %s14_s10 = sshll.u32 %s132_s9, 4  ;;  %s133_s11 = smov 128   ;;  %s15_s10 = int_to_ptr.vmem [resolvable:$true] %s14_s10 }
   0x3   :  { %s134_s12 = smov 8  }
   0x4   :  { %20 = dma.hbm_to_vmem [thread:$0]  %s13_s8, 256, %s15_s10, [#allocation3], %s133_s11, %s133_s11, %s134_s12  }
   0x5   :  { %128 = dma.done.wait [#allocation3], 256  }
   0x6   :  { %129 = vsyncadd [#allocation3], 4294967040  ;;  %v25_v0 = vld [vmem:[#allocation2] sm:$0xff]  ;;  %v26_v1 = vld [vmem:[#allocation2 + $0x8] sm:$0xff]  ;;  %s135_s0 = smov [#allocation5]   ;;  %s45_s16 = sshll.u32 %s159_s1, 4  ;;  %s46_s16 = int_to_ptr.hbm [resolvable:$true] %s45_s16 }
   0x7   :  { %v58_v2 = vclamps-f32 %v25_v0, 1.0  ;;  %v59_v3 = vclamps-f32 %v26_v1, 1.0  ;;  %s43_s13 = sshll.u32 %s135_s0, 4  ;;  %s44_s13 = int_to_ptr.vmem [resolvable:$true] %s43_s13 }
   0x9   :  { %v31_v4 = vmul.f32 7.0, %v58_v2  ;;  %v32_v5 = vmul.f32 7.0, %v59_v3 }
   0xb   :  { %v62_v6 = vcvt.f32.s32 %v31_v4  ;;  %v60_v7 = vand.u32 2147483647, %v31_v4  ;;  %v70_v8 = vcvt.f32.s32 %v32_v5  ;;  %v65_v10 = vand.u32 2147483648, %v31_v4 }
   0xc   :  { %v68_v11 = vand.u32 2147483647, %v32_v5  ;;  %v73_v13 = vand.u32 2147483648, %v32_v5 }
   0xd   :  { %v63_v9 = vcvt.s32.f32 %v62_v6  ;;  %v71_v12 = vcvt.s32.f32 %v70_v8  ;;  %vm61_vm0 = vcmp.lt.f32.partialorder %v60_v7, 8388608.0 }
   0xe   :  { %vm69_vm1 = vcmp.lt.f32.partialorder %v68_v11, 8388608.0 }
   0xf   :  { %v64_v14 = vand.u32 2147483647, %v63_v9  ;;  %v72_v15 = vand.u32 2147483647, %v71_v12 }
  0x11   :  { %v66_v16 = vor.u32 %v65_v10, %v64_v14  ;;  %v74_v17 = vor.u32 %v73_v13, %v72_v15 }
  0x13   :  { %v67_v18 = vsel %vm61_vm0, %v66_v16, %v31_v4  ;;  %v75_v20 = vsel %vm69_vm1, %v74_v17, %v32_v5 }
  0x14   :  { %v35_v19 = vmul.f32 0.14285715, %v67_v18  ;;  %v36_v21 = vmul.f32 0.14285715, %v75_v20 }
  0x16   :  { %37 = vst [vmem:[#allocation5] sm:$0xff] %v35_v19 }
  0x17   :  { %38 = vst [vmem:[#allocation5 + $0x8] sm:$0xff] %v36_v21 }
  0x18   :  { %51 = dma.vmem_to_hbm [thread:$0]  %s44_s13, 256, %s46_s16, [#allocation4], %s133_s11, %s133_s11, %s134_s12  }
  0x19   :  { %130 = dma.done.wait [#allocation4], 256  }
  0x1a   :  { %131 = vsyncadd [#allocation4], 4294967040 }
  0x1b   :  { %56 = vsyncpa [#allocation3], 1 }
  0x1c   :  { %57 = vsyncpa [#allocation4], 1 }

</bundles_post_ra>
